<compile_context>
chip_gen: v5e
topology: v5e:2x2
jax: 0.10.0
libtpu: 0.0.40
codegen_flags: <defaults>
</compile_context>

<pallas_src>
import numpy as np
import jax
import jax.numpy as jnp
from jax.experimental import pallas as pl
from jax.experimental.pallas import tpu as pltpu

VMEM = pl.BlockSpec(memory_space=pltpu.MemorySpace.VMEM)
K = 3  # conv kernel size


def _round_up(n, m):
    return ((n + m - 1) // m) * m


# ---------------------------------------------------------------------------
# Fused predict() kernel factory
# ---------------------------------------------------------------------------
def build_predict(B, Cin, H, W, Cout, NC):
    HP, WP = H + 2, W + 2                       # padded spatial (pad=1)
    SEG = _round_up(HP * WP, 128)               # per-image lane segment (324 -> 384)
    STOT = B * SEG                              # total lane width (768)

    def kernel(x_ref, w_ref, b_ref, pool_ref, hw_ref, hb_ref, o_ref):
        # x_ref   : (Cin, STOT)   padded images, spatial flattened on lanes
        # w_ref   : (K*K, Cout, Cin) conv taps
        # b_ref   : (Cout, 1)     conv bias (broadcast over lanes)
        # pool_ref: (B, STOT)     masked avg-pool matrix (1/(H*W) at valid pos)
        # hw_ref  : (Cout, NC)    lin_w.T * class_weights / temperature (folded)
        # hb_ref  : (1, NC)       lin_b  * class_weights / temperature (folded)
        # o_ref   : (B, NC)       softmax probabilities
        x = x_ref[...]
        acc = jnp.zeros((Cout, STOT), jnp.float32)
        # 3x3 conv = 9 shifted matmuls; shift = lane roll by kh*WP + kw.
        # Valid output positions only ever read within their own 384-lane
        # segment (max base 285 + max shift 38 < 384), wrap pollution is
        # confined to positions masked out by pool_ref.
        for kh in range(K):
            for kw in range(K):
                s = kh * WP + kw
                xs = x if s == 0 else pltpu.roll(x, shift=STOT - s, axis=1)
                acc = acc + jnp.dot(w_ref[kh * K + kw], xs,
                                    preferred_element_type=jnp.float32)
        # bias + ReLU per spatial element (must precede pooling).
        feat = jnp.maximum(acc + b_ref[...], 0.0)            # (Cout, STOT)
        # Fused masked global-average-pool: contract the lane (spatial) axis.
        # NT dot: (B, STOT) . (Cout, STOT)^T -> (B, Cout)
        pooled = jax.lax.dot_general(
            pool_ref[...], feat, (((1,), (1,)), ((), ())),
            preferred_element_type=jnp.float32)               # (B, Cout)
        # Head with class_weights/temperature pre-folded into hw/hb.
        logits = jnp.dot(pooled, hw_ref[...],
                         preferred_element_type=jnp.float32) + hb_ref[...]
        # Stable softmax over classes (lane axis).
        m = jnp.max(logits, axis=-1, keepdims=True)
        e = jnp.exp(logits - m)
        o_ref[...] = e / jnp.sum(e, axis=-1, keepdims=True)

    fused = pl.pallas_call(
        kernel,
        out_shape=jax.ShapeDtypeStruct((B, NC), jnp.float32),
        in_specs=[VMEM] * 6,
        out_specs=VMEM,
    )

    def prepare_input(x):
        # (B, Cin, H, W) -> (Cin, B*SEG): pad by 1, flatten spatial, pad each
        # image's flat spatial to a 128-multiple lane segment. ~1.27x copy of
        # the input (vs 9x for im2col).
        xp = jnp.pad(x, ((0, 0), (0, 0), (1, 1), (1, 1)))      # (B,Cin,HP,WP)
        xp = xp.reshape(B, Cin, HP * WP)
        xp = jnp.pad(xp, ((0, 0), (0, 0), (0, SEG - HP * WP))) # (B,Cin,SEG)
        return xp.transpose(1, 0, 2).reshape(Cin, STOT)

    @jax.jit
    def predict(x, w_taps, b_col, pool_t, head_w, head_b):
        return fused(prepare_input(x), w_taps, b_col, pool_t, head_w, head_b)

    def prepare_params(params):
        """One-time fold of constants into kernel-friendly layouts."""
        conv_w, conv_b, lin_w, lin_b, temperature, class_weights = params
        # (Cout, Cin, K, K) -> (K*K, Cout, Cin), tap t = kh*K + kw
        w_taps = jnp.transpose(conv_w, (2, 3, 0, 1)).reshape(K * K, Cout, Cin)
        b_col = conv_b.reshape(Cout, 1)
        # Fold class_weights and 1/temperature into the linear head.
        scale = class_weights / temperature[0]                 # (NC,)
        head_w = (lin_w.T * scale[None, :]).astype(jnp.float32)  # (Cout, NC)
        head_b = (lin_b * scale).reshape(1, NC).astype(jnp.float32)
        # Masked average-pool matrix: 1/(H*W) at valid (non-padding) positions.
        pool = np.zeros((B, STOT), np.float32)
        inv = 1.0 / float(H * W)
        for b in range(B):
            for i in range(H):
                for j in range(W):
                    pool[b, b * SEG + i * WP + j] = inv
        return (w_taps, b_col, jnp.asarray(pool), head_w, head_b)

    return predict, prepare_params


# ---------------------------------------------------------------------------
# Deterministic parameter initialization (mirrors _initialize_weights)
# ---------------------------------------------------------------------------
def make_params(key, in_channels, hidden, num_classes, k=3,
                class_counts=(100, 100)):
    k1, k2, k3 = jax.random.split(key, 3)
    # Conv2d: kaiming_normal_(mode='fan_out', nonlinearity='relu'), bias = 0.01
    fan_out = hidden * k * k
    conv_w = jax.random.normal(k1, (hidden, in_channels, k, k),
                               jnp.float32) * np.sqrt(2.0 / fan_out)
    conv_b = jnp.full((hidden,), 0.01, jnp.float32)
    # Linear: normal(0, sqrt(2/(fan_in+fan_out))), bias ~ U(-1/sqrt(fan_in), ..)
    fan_in, fan_o = hidden, num_classes
    lin_w = jax.random.normal(k2, (num_classes, hidden),
                              jnp.float32) * np.sqrt(2.0 / (fan_in + fan_o))
    bound = 1.0 / np.sqrt(fan_in)
    lin_b = jax.random.uniform(k3, (num_classes,), jnp.float32, -bound, bound)
    # temperature = 1.5
    temperature = jnp.ones((1,), jnp.float32) * 1.5
    # class weights: total/(nc*count), normalized to sum 1
    total = float(sum(class_counts))
    cw = np.array([total / (num_classes * c) for c in class_counts], np.float32)
    class_weights = jnp.asarray(cw / cw.sum())
    return conv_w, conv_b, lin_w, lin_b, temperature, class_weights


# ---------------------------------------------------------------------------
# Pure-JAX reference for correctness check (unfolded params)
# ---------------------------------------------------------------------------
def predict_ref(x, params):
    conv_w, conv_b, lin_w, lin_b, temperature, class_weights = params
    y = jax.lax.conv_general_dilated(
        x, conv_w, window_strides=(1, 1), padding=((1, 1), (1, 1)),
        dimension_numbers=("NCHW", "OIHW", "NCHW"))
    y = jax.nn.relu(y + conv_b[None, :, None, None])
    pooled = y.mean(axis=(2, 3))                               # (B, Cout)
    logits = pooled @ lin_w.T + lin_b
    logits = logits / temperature[0]
    weighted = logits * class_weights[None, :]
    return jax.nn.softmax(weighted, axis=1)


if __name__ == "__main__":
    B, Cin, H, W = 2, 4, 16, 16
    Cout, NC = 8, 2

    key = jax.random.PRNGKey(0)
    kx, kp = jax.random.split(key)
    x = jax.random.normal(kx, (B, Cin, H, W), jnp.float32)
    params = make_params(kp, Cin, Cout, NC)

    predict, prepare_params = build_predict(B, Cin, H, W, Cout, NC)
    prep = prepare_params(params)   # one-time constant fold / re-layout

    out = jax.block_until_ready(predict(x, *prep))

    ref = predict_ref(x, params)
    np.testing.assert_allclose(np.asarray(out), np.asarray(ref),
                               rtol=1e-4, atol=2e-5)
    assert out.shape == (B, NC)
    print("KERNEL_OK")
</pallas_src>

<mosaic_0001>
module attributes {stable_mosaic.version = 11 : i64} {
  func.func @kernel(%arg0: memref<4x768xf32, #tpu.memory_space<vmem>>, %arg1: memref<9x8x4xf32, #tpu.memory_space<vmem>>, %arg2: memref<8x1xf32, #tpu.memory_space<vmem>>, %arg3: memref<2x768xf32, #tpu.memory_space<vmem>>, %arg4: memref<8x2xf32, #tpu.memory_space<vmem>>, %arg5: memref<1x2xf32, #tpu.memory_space<vmem>>, %arg6: memref<2x2xf32, #tpu.memory_space<vmem>>) attributes {dimension_semantics = [], scalar_prefetch = 0 : i64, scratch_operands = 0 : i64, tpu.core_type = #tpu.core_type<tc>} {
    %c0 = arith.constant 0 : index
    %c0_0 = arith.constant 0 : index
    %0 = vector.load %arg0[%c0, %c0_0] : memref<4x768xf32, #tpu.memory_space<vmem>>, vector<4x768xf32>
    %cst = arith.constant 0.000000e+00 : f32
    %1 = vector.broadcast %cst : f32 to vector<8x768xf32>
    %c0_1 = arith.constant 0 : index
    %c0_2 = arith.constant 0 : index
    %c0_3 = arith.constant 0 : index
    %2 = vector.load %arg1[%c0_1, %c0_2, %c0_3] : memref<9x8x4xf32, #tpu.memory_space<vmem>>, vector<1x8x4xf32>
    %3 = vector.shape_cast %2 : vector<1x8x4xf32> to vector<8x4xf32>
    %cst_4 = arith.constant dense<0.000000e+00> : vector<8x768xf32>
    %4 = tpu.matmul %3, %0, %cst_4 {dimension_numbers = #tpu.dot_dimension_numbers<[1], [0], [0], [1], [0, 0, 1, 1], [], []>} : vector<8x4xf32>, vector<4x768xf32>, vector<8x768xf32> -> vector<8x768xf32>
    %5 = arith.addf %1, %4 : vector<8x768xf32>
    %c767_i32 = arith.constant 767 : i32
    %6 = tpu.dynamic_rotate %0 by %c767_i32 dim 1 : vector<4x768xf32>, i32 -> vector<4x768xf32>
    %c1 = arith.constant 1 : index
    %c0_5 = arith.constant 0 : index
    %c0_6 = arith.constant 0 : index
    %7 = vector.load %arg1[%c1, %c0_5, %c0_6] : memref<9x8x4xf32, #tpu.memory_space<vmem>>, vector<1x8x4xf32>
    %8 = vector.shape_cast %7 : vector<1x8x4xf32> to vector<8x4xf32>
    %cst_7 = arith.constant dense<0.000000e+00> : vector<8x768xf32>
    %9 = tpu.matmul %8, %6, %cst_7 {dimension_numbers = #tpu.dot_dimension_numbers<[1], [0], [0], [1], [0, 0, 1, 1], [], []>} : vector<8x4xf32>, vector<4x768xf32>, vector<8x768xf32> -> vector<8x768xf32>
    %10 = arith.addf %5, %9 : vector<8x768xf32>
    %c766_i32 = arith.constant 766 : i32
    %11 = tpu.dynamic_rotate %0 by %c766_i32 dim 1 : vector<4x768xf32>, i32 -> vector<4x768xf32>
    %c2 = arith.constant 2 : index
    %c0_8 = arith.constant 0 : index
    %c0_9 = arith.constant 0 : index
    %12 = vector.load %arg1[%c2, %c0_8, %c0_9] : memref<9x8x4xf32, #tpu.memory_space<vmem>>, vector<1x8x4xf32>
    %13 = vector.shape_cast %12 : vector<1x8x4xf32> to vector<8x4xf32>
    %cst_10 = arith.constant dense<0.000000e+00> : vector<8x768xf32>
    %14 = tpu.matmul %13, %11, %cst_10 {dimension_numbers = #tpu.dot_dimension_numbers<[1], [0], [0], [1], [0, 0, 1, 1], [], []>} : vector<8x4xf32>, vector<4x768xf32>, vector<8x768xf32> -> vector<8x768xf32>
    %15 = arith.addf %10, %14 : vector<8x768xf32>
    %c750_i32 = arith.constant 750 : i32
    %16 = tpu.dynamic_rotate %0 by %c750_i32 dim 1 : vector<4x768xf32>, i32 -> vector<4x768xf32>
    %c3 = arith.constant 3 : index
    %c0_11 = arith.constant 0 : index
    %c0_12 = arith.constant 0 : index
    %17 = vector.load %arg1[%c3, %c0_11, %c0_12] : memref<9x8x4xf32, #tpu.memory_space<vmem>>, vector<1x8x4xf32>
    %18 = vector.shape_cast %17 : vector<1x8x4xf32> to vector<8x4xf32>
    %cst_13 = arith.constant dense<0.000000e+00> : vector<8x768xf32>
    %19 = tpu.matmul %18, %16, %cst_13 {dimension_numbers = #tpu.dot_dimension_numbers<[1], [0], [0], [1], [0, 0, 1, 1], [], []>} : vector<8x4xf32>, vector<4x768xf32>, vector<8x768xf32> -> vector<8x768xf32>
    %20 = arith.addf %15, %19 : vector<8x768xf32>
    %c749_i32 = arith.constant 749 : i32
    %21 = tpu.dynamic_rotate %0 by %c749_i32 dim 1 : vector<4x768xf32>, i32 -> vector<4x768xf32>
    %c4 = arith.constant 4 : index
    %c0_14 = arith.constant 0 : index
    %c0_15 = arith.constant 0 : index
    %22 = vector.load %arg1[%c4, %c0_14, %c0_15] : memref<9x8x4xf32, #tpu.memory_space<vmem>>, vector<1x8x4xf32>
    %23 = vector.shape_cast %22 : vector<1x8x4xf32> to vector<8x4xf32>
    %cst_16 = arith.constant dense<0.000000e+00> : vector<8x768xf32>
    %24 = tpu.matmul %23, %21, %cst_16 {dimension_numbers = #tpu.dot_dimension_numbers<[1], [0], [0], [1], [0, 0, 1, 1], [], []>} : vector<8x4xf32>, vector<4x768xf32>, vector<8x768xf32> -> vector<8x768xf32>
    %25 = arith.addf %20, %24 : vector<8x768xf32>
    %c748_i32 = arith.constant 748 : i32
    %26 = tpu.dynamic_rotate %0 by %c748_i32 dim 1 : vector<4x768xf32>, i32 -> vector<4x768xf32>
    %c5 = arith.constant 5 : index
    %c0_17 = arith.constant 0 : index
    %c0_18 = arith.constant 0 : index
    %27 = vector.load %arg1[%c5, %c0_17, %c0_18] : memref<9x8x4xf32, #tpu.memory_space<vmem>>, vector<1x8x4xf32>
    %28 = vector.shape_cast %27 : vector<1x8x4xf32> to vector<8x4xf32>
    %cst_19 = arith.constant dense<0.000000e+00> : vector<8x768xf32>
    %29 = tpu.matmul %28, %26, %cst_19 {dimension_numbers = #tpu.dot_dimension_numbers<[1], [0], [0], [1], [0, 0, 1, 1], [], []>} : vector<8x4xf32>, vector<4x768xf32>, vector<8x768xf32> -> vector<8x768xf32>
    %30 = arith.addf %25, %29 : vector<8x768xf32>
    %c732_i32 = arith.constant 732 : i32
    %31 = tpu.dynamic_rotate %0 by %c732_i32 dim 1 : vector<4x768xf32>, i32 -> vector<4x768xf32>
    %c6 = arith.constant 6 : index
    %c0_20 = arith.constant 0 : index
    %c0_21 = arith.constant 0 : index
    %32 = vector.load %arg1[%c6, %c0_20, %c0_21] : memref<9x8x4xf32, #tpu.memory_space<vmem>>, vector<1x8x4xf32>
    %33 = vector.shape_cast %32 : vector<1x8x4xf32> to vector<8x4xf32>
    %cst_22 = arith.constant dense<0.000000e+00> : vector<8x768xf32>
    %34 = tpu.matmul %33, %31, %cst_22 {dimension_numbers = #tpu.dot_dimension_numbers<[1], [0], [0], [1], [0, 0, 1, 1], [], []>} : vector<8x4xf32>, vector<4x768xf32>, vector<8x768xf32> -> vector<8x768xf32>
    %35 = arith.addf %30, %34 : vector<8x768xf32>
    %c731_i32 = arith.constant 731 : i32
    %36 = tpu.dynamic_rotate %0 by %c731_i32 dim 1 : vector<4x768xf32>, i32 -> vector<4x768xf32>
    %c7 = arith.constant 7 : index
    %c0_23 = arith.constant 0 : index
    %c0_24 = arith.constant 0 : index
    %37 = vector.load %arg1[%c7, %c0_23, %c0_24] : memref<9x8x4xf32, #tpu.memory_space<vmem>>, vector<1x8x4xf32>
    %38 = vector.shape_cast %37 : vector<1x8x4xf32> to vector<8x4xf32>
    %cst_25 = arith.constant dense<0.000000e+00> : vector<8x768xf32>
    %39 = tpu.matmul %38, %36, %cst_25 {dimension_numbers = #tpu.dot_dimension_numbers<[1], [0], [0], [1], [0, 0, 1, 1], [], []>} : vector<8x4xf32>, vector<4x768xf32>, vector<8x768xf32> -> vector<8x768xf32>
    %40 = arith.addf %35, %39 : vector<8x768xf32>
    %c730_i32 = arith.constant 730 : i32
    %41 = tpu.dynamic_rotate %0 by %c730_i32 dim 1 : vector<4x768xf32>, i32 -> vector<4x768xf32>
    %c8 = arith.constant 8 : index
    %c0_26 = arith.constant 0 : index
    %c0_27 = arith.constant 0 : index
    %42 = vector.load %arg1[%c8, %c0_26, %c0_27] : memref<9x8x4xf32, #tpu.memory_space<vmem>>, vector<1x8x4xf32>
    %43 = vector.shape_cast %42 : vector<1x8x4xf32> to vector<8x4xf32>
    %cst_28 = arith.constant dense<0.000000e+00> : vector<8x768xf32>
    %44 = tpu.matmul %43, %41, %cst_28 {dimension_numbers = #tpu.dot_dimension_numbers<[1], [0], [0], [1], [0, 0, 1, 1], [], []>} : vector<8x4xf32>, vector<4x768xf32>, vector<8x768xf32> -> vector<8x768xf32>
    %45 = arith.addf %40, %44 : vector<8x768xf32>
    %c0_29 = arith.constant 0 : index
    %c0_30 = arith.constant 0 : index
    %46 = vector.load %arg2[%c0_29, %c0_30] : memref<8x1xf32, #tpu.memory_space<vmem>>, vector<8x1xf32>
    %47 = vector.broadcast %46 : vector<8x1xf32> to vector<8x768xf32>
    %48 = arith.addf %45, %47 : vector<8x768xf32>
    %cst_31 = arith.constant 0.000000e+00 : f32
    %49 = vector.broadcast %cst_31 : f32 to vector<8x768xf32>
    %50 = arith.maximumf %48, %49 : vector<8x768xf32>
    %c0_32 = arith.constant 0 : index
    %c0_33 = arith.constant 0 : index
    %51 = vector.load %arg3[%c0_32, %c0_33] : memref<2x768xf32, #tpu.memory_space<vmem>>, vector<2x768xf32>
    %cst_34 = arith.constant dense<0.000000e+00> : vector<2x8xf32>
    %52 = tpu.matmul %51, %50, %cst_34 {dimension_numbers = #tpu.dot_dimension_numbers<[1], [1], [0], [0], [0, 0, 1, 0], [], []>} : vector<2x768xf32>, vector<8x768xf32>, vector<2x8xf32> -> vector<2x8xf32>
    %c0_35 = arith.constant 0 : index
    %c0_36 = arith.constant 0 : index
    %53 = vector.load %arg4[%c0_35, %c0_36] : memref<8x2xf32, #tpu.memory_space<vmem>>, vector<8x2xf32>
    %cst_37 = arith.constant dense<0.000000e+00> : vector<2x2xf32>
    %54 = tpu.matmul %52, %53, %cst_37 {dimension_numbers = #tpu.dot_dimension_numbers<[1], [0], [0], [1], [0, 0, 1, 1], [], []>} : vector<2x8xf32>, vector<8x2xf32>, vector<2x2xf32> -> vector<2x2xf32>
    %c0_38 = arith.constant 0 : index
    %c0_39 = arith.constant 0 : index
    %55 = vector.load %arg5[%c0_38, %c0_39] : memref<1x2xf32, #tpu.memory_space<vmem>>, vector<1x2xf32>
    %56 = vector.broadcast %55 : vector<1x2xf32> to vector<2x2xf32>
    %57 = arith.addf %54, %56 : vector<2x2xf32>
    %cst_40 = arith.constant dense<0xFF800000> : vector<2xf32>
    %58 = vector.multi_reduction <maximumf>, %57, %cst_40 [1] : vector<2x2xf32> to vector<2xf32>
    %59 = vector.shape_cast %58 : vector<2xf32> to vector<2x1xf32>
    %60 = vector.broadcast %59 : vector<2x1xf32> to vector<2x2xf32>
    %61 = arith.subf %57, %60 : vector<2x2xf32>
    %62 = math.exp %61 : vector<2x2xf32>
    %cst_41 = arith.constant dense<0.000000e+00> : vector<2xf32>
    %63 = vector.multi_reduction <add>, %62, %cst_41 [1] : vector<2x2xf32> to vector<2xf32>
    %64 = vector.shape_cast %63 : vector<2xf32> to vector<2x1xf32>
    %65 = vector.broadcast %64 : vector<2x1xf32> to vector<2x2xf32>
    %66 = arith.divf %62, %65 : vector<2x2xf32>
    %c0_42 = arith.constant 0 : index
    %c0_43 = arith.constant 0 : index
    %67 = vector.load %arg6[%c0_42, %c0_43] : memref<2x2xf32, #tpu.memory_space<vmem>>, vector<2x2xf32>
    tpu.vector_store %arg6[%c0_42, %c0_43], %66 {strides = array<i32>} : memref<2x2xf32, #tpu.memory_space<vmem>>, vector<2x2xf32>,
    return
  }
}

</mosaic_0001>

<bundles_post_ra>
// kernel: predict.1
= control target key start
LH: loop header
LB: loop body
LE: loop exit
PB: predicated region body
PF: predicated region fallthrough
CT: control target
= control target key end

     0   :  { %s2440_s0 = inlined_call_operand.vmem [shape: f32[4,768], index: 0, kind: input, shape index: {}]   ;;  %s2441_s1 = inlined_call_operand.vmem [shape: f32[9,8,4], index: 1, kind: input, shape index: {}]   ;;  %s2442_s2 = inlined_call_operand.vmem [shape: f32[8,1], index: 2, kind: input, shape index: {}]   ;;  %s2443_s3 = inlined_call_operand.vmem [shape: f32[2,768], index: 3, kind: input, shape index: {}]   ;;  %s2444_s4 = inlined_call_operand.vmem [shape: f32[8,2], index: 4, kind: input, shape index: {}]   ;;  %s2445_s5 = inlined_call_operand.vmem [shape: f32[1,2], index: 5, kind: input, shape index: {}]   ;;  %s2446_s6 = inlined_call_operand.hbm [shape: f32[2,2], index: 6, kind: output, shape index: {}]  }
   0x1   :  { %v2090_v0 = vld [vmem:[%s2440_s0 + $0x8] sm:$0xff]  ;;  %v2095_v1 = vld [vmem:[%s2440_s0] sm:$0xff]  ;;  %v2100_v2 = vld [vmem:[%s2440_s0 + $0x10] sm:$0xff] }
   0x2   :  { %33 = vst [vmem:[#allocation1 + $0x10] ss:$2 sm:$0xff] %v2090_v0 }
   0x3   :  { %31 = vst [vmem:[#allocation1] ss:$2 sm:$0xff] %v2095_v1 }
   0x4   :  { %11 = vsyncpa [#allocation3], 0  ;;  %35 = vst [vmem:[#allocation1 + $0x20] ss:$2 sm:$0xff] %v2100_v2  ;;  %s2042_s27 = smov 127   ;;  %s2043_s0 = smov 126   ;;  %v60_v58 = vlaneseq }
   0x5   :  { %s2044_s28 = smov 110   ;;  %s2045_s29 = smov 109   ;;  %vm75_vm0 = vcmask 1043456   ;;  %vm71_vm2 = vcmask 31744   ;;  %vm1817_vm10 = vcmask 64512   ;;  %vm1841_vm11 = vcmask 9216  }
   0x6   :  { %s2046_s30 = smov 108   ;;  %s2047_s7 = smov 92   ;;  %v2143_v61 = vand.u32 127, %v60_v58 }
   0x7   :  { %s2048_s8 = smov 91   ;;  %s2049_s9 = smov 90  }
   0x8   :  { %vm62_vm1 = vcmp.lt.s32.totalorder %v2143_v61, 127  ;;  %vm389_vm3 = vcmp.lt.s32.totalorder %v2143_v61, 126  ;;  %vm574_vm4 = vcmp.lt.s32.totalorder %v2143_v61, 110  ;;  %vm759_vm5 = vcmp.lt.s32.totalorder %v2143_v61, 109  ;;  %s1874_s12 = sshll.u32 %s2446_s6, 4  ;;  %s1875_s12 = int_to_ptr.hbm [resolvable:$true] %s1874_s12 }
   0x9   :  { %v38_v3 = vld.sshfl [vmem:[#allocation1 + $0x10] sm:$0xff pattern:$0x75316420]  ;;  %v39_v4 = vld.sshfl [vmem:[#allocation1 + $0x18] sm:$0xff pattern:$0x75316420] }
   0xa   :  { %52 = vrot.lane.b32.xlu1 %v38_v3, %s2042_s27  ;;  %v36_v5 = vld.sshfl [vmem:[#allocation1] sm:$0xff pattern:$0x75316420]  ;;  %216 = vst [vmem:[#allocation1 + $0x10] ss:$2 sm:$0xff] %v2090_v0  ;;  %vm944_vm6 = vcmp.lt.s32.totalorder %v2143_v61, 108 }
   0xb   :  { %48 = vrot.lane.b32.xlu0 %v36_v5, %s2042_s27  ;;  %v37_v6 = vld.sshfl [vmem:[#allocation1 + $0x8] sm:$0xff pattern:$0x75316420]  ;;  %v40_v7 = vld.sshfl [vmem:[#allocation1 + $0x20] sm:$0xff pattern:$0x75316420] }
   0xc   :  { %214 = vst [vmem:[#allocation1] ss:$2 sm:$0xff] %v2095_v1  ;;  %56 = vrot.lane.b32.xlu2 %v40_v7, %s2042_s27  ;;  %v41_v8 = vld.sshfl [vmem:[#allocation1 + $0x28] sm:$0xff pattern:$0x75316420]  ;;  %vm1129_vm7 = vcmp.lt.s32.totalorder %v2143_v61, 92 }
   0xd   :  { %218 = vst [vmem:[#allocation1 + $0x20] ss:$2 sm:$0xff] %v2100_v2  ;;  %v1883_v5 = vld [vmem:[%s2441_s1 + $0x8] sm:$0xff]  ;;  %vm1314_vm8 = vcmp.lt.s32.totalorder %v2143_v61, 91  ;;  %vm1499_vm9 = vcmp.lt.s32.totalorder %v2143_v61, 90 }
  0x11   :  { %v2108_v9 = vld.sshfl [vmem:[#allocation1 + $0x10] sm:$0xff pattern:$0x75316420]  ;;  %v2110_v10 = vld.sshfl [vmem:[#allocation1 + $0x18] sm:$0xff pattern:$0x75316420] }
  0x12   :  { %54 = vrot.lane.b32.xlu1 %v39_v4, %s2042_s27  ;;  %362 = vst [vmem:[#allocation1 + $0x10] ss:$2 sm:$0xff] %v2090_v0 }
  0x13   :  { %50 = vrot.lane.b32.xlu0 %v37_v6, %s2042_s27  ;;  %v2113_v11 = vld.sshfl [vmem:[#allocation1] sm:$0xff pattern:$0x75316420]  ;;  %v2115_v12 = vld.sshfl [vmem:[#allocation1 + $0x8] sm:$0xff pattern:$0x75316420] }
  0x14   :  { %360 = vst [vmem:[#allocation1] ss:$2 sm:$0xff] %v2095_v1  ;;  %58 = vrot.lane.b32.xlu2 %v41_v8, %s2042_s27  ;;  %v2118_v13 = vld.sshfl [vmem:[#allocation1 + $0x20] sm:$0xff pattern:$0x75316420] }
  0x15   :  { %v2120_v14 = vld.sshfl [vmem:[#allocation1 + $0x28] sm:$0xff pattern:$0x75316420] }
  0x16   :  { %364 = vst [vmem:[#allocation1 + $0x20] ss:$2 sm:$0xff] %v2100_v2 }
  0x19   :  { %v368_v15 = vld.sshfl [vmem:[#allocation1 + $0x18] sm:$0xff pattern:$0x75316420]  ;;  %v367_v16 = vld.sshfl [vmem:[#allocation1 + $0x10] sm:$0xff pattern:$0x75316420] }
  0x1a   :  { %547 = vst [vmem:[#allocation1 + $0x10] ss:$2 sm:$0xff] %v2090_v0 }
  0x1b   :  { %v366_v17 = vld.sshfl [vmem:[#allocation1 + $0x8] sm:$0xff pattern:$0x75316420]  ;;  %v365_v18 = vld.sshfl [vmem:[#allocation1] sm:$0xff pattern:$0x75316420] }
  0x1c   :  { %379 = vrot.lane.b32.xlu1 %v366_v17, %s2043_s0  ;;  %377 = vrot.lane.b32.xlu0 %v365_v18, %s2043_s0  ;;  %545 = vst [vmem:[#allocation1] ss:$2 sm:$0xff] %v2095_v1 }
  0x1d   :  { %v369_v19 = vld.sshfl [vmem:[#allocation1 + $0x20] sm:$0xff pattern:$0x75316420]  ;;  %381 = vrot.lane.b32.xlu2 %v367_v16, %s2043_s0  ;;  %v370_v20 = vld.sshfl [vmem:[#allocation1 + $0x28] sm:$0xff pattern:$0x75316420] }
  0x1e   :  { %549 = vst [vmem:[#allocation1 + $0x20] ss:$2 sm:$0xff] %v2100_v2 }
  0x21   :  { %v553_v21 = vld.sshfl [vmem:[#allocation1 + $0x18] sm:$0xff pattern:$0x75316420]  ;;  %v552_v22 = vld.sshfl [vmem:[#allocation1 + $0x10] sm:$0xff pattern:$0x75316420] }
  0x22   :  { %732 = vst [vmem:[#allocation1 + $0x10] ss:$2 sm:$0xff] %v2090_v0 }
  0x23   :  { %v551_v23 = vld.sshfl [vmem:[#allocation1 + $0x8] sm:$0xff pattern:$0x75316420]  ;;  %v550_v24 = vld.sshfl [vmem:[#allocation1] sm:$0xff pattern:$0x75316420] }
  0x24   :  { %385 = vrot.lane.b32.xlu1 %v369_v19, %s2043_s0  ;;  %383 = vrot.lane.b32.xlu0 %v368_v15, %s2043_s0  ;;  %730 = vst [vmem:[#allocation1] ss:$2 sm:$0xff] %v2095_v1 }
  0x25   :  { %387 = vrot.lane.b32.xlu2 %v370_v20, %s2043_s0  ;;  %v554_v25 = vld.sshfl [vmem:[#allocation1 + $0x20] sm:$0xff pattern:$0x75316420]  ;;  %v555_v26 = vld.sshfl [vmem:[#allocation1 + $0x28] sm:$0xff pattern:$0x75316420] }
  0x26   :  { %734 = vst [vmem:[#allocation1 + $0x20] ss:$2 sm:$0xff] %v2100_v2 }
  0x29   :  { %v738_v27 = vld.sshfl [vmem:[#allocation1 + $0x18] sm:$0xff pattern:$0x75316420]  ;;  %v737_v28 = vld.sshfl [vmem:[#allocation1 + $0x10] sm:$0xff pattern:$0x75316420] }
  0x2a   :  { %917 = vst [vmem:[#allocation1 + $0x10] ss:$2 sm:$0xff] %v2090_v0 }
  0x2b   :  { %v736_v29 = vld.sshfl [vmem:[#allocation1 + $0x8] sm:$0xff pattern:$0x75316420]  ;;  %v735_v30 = vld.sshfl [vmem:[#allocation1] sm:$0xff pattern:$0x75316420] }
  0x2c   :  { %564 = vrot.lane.b32.xlu1 %v551_v23, %s2044_s28  ;;  %562 = vrot.lane.b32.xlu0 %v550_v24, %s2044_s28  ;;  %915 = vst [vmem:[#allocation1] ss:$2 sm:$0xff] %v2095_v1 }
  0x2d   :  { %566 = vrot.lane.b32.xlu2 %v552_v22, %s2044_s28  ;;  %v739_v31 = vld.sshfl [vmem:[#allocation1 + $0x20] sm:$0xff pattern:$0x75316420]  ;;  %v740_v32 = vld.sshfl [vmem:[#allocation1 + $0x28] sm:$0xff pattern:$0x75316420] }
  0x2e   :  { %919 = vst [vmem:[#allocation1 + $0x20] ss:$2 sm:$0xff] %v2100_v2 }
  0x31   :  { %v923_v35 = vld.sshfl [vmem:[#allocation1 + $0x18] sm:$0xff pattern:$0x75316420]  ;;  %v922_v36 = vld.sshfl [vmem:[#allocation1 + $0x10] sm:$0xff pattern:$0x75316420] }
  0x32   :  { %1102 = vst [vmem:[#allocation1 + $0x10] ss:$2 sm:$0xff] %v2090_v0 }
  0x33   :  { %v921_v33 = vld.sshfl [vmem:[#allocation1 + $0x8] sm:$0xff pattern:$0x75316420]  ;;  %v920_v34 = vld.sshfl [vmem:[#allocation1] sm:$0xff pattern:$0x75316420] }
  0x34   :  { %570 = vrot.lane.b32.xlu1 %v554_v25, %s2044_s28  ;;  %568 = vrot.lane.b32.xlu0 %v553_v21, %s2044_s28  ;;  %1100 = vst [vmem:[#allocation1] ss:$2 sm:$0xff] %v2095_v1 }
  0x35   :  { %572 = vrot.lane.b32.xlu2 %v555_v26, %s2044_s28  ;;  %v924_v37 = vld.sshfl [vmem:[#allocation1 + $0x20] sm:$0xff pattern:$0x75316420]  ;;  %v925_v40 = vld.sshfl [vmem:[#allocation1 + $0x28] sm:$0xff pattern:$0x75316420] }
  0x36   :  { %1104 = vst [vmem:[#allocation1 + $0x20] ss:$2 sm:$0xff] %v2100_v2  ;;  %v1908_v26 = vld [vmem:[%s2441_s1 + $0x10] sm:$0xff] }
  0x39   :  { %v1108_v41 = vld.sshfl [vmem:[#allocation1 + $0x18] sm:$0xff pattern:$0x75316420]  ;;  %v1107_v42 = vld.sshfl [vmem:[#allocation1 + $0x10] sm:$0xff pattern:$0x75316420] }
  0x3a   :  { %1287 = vst [vmem:[#allocation1 + $0x10] ss:$2 sm:$0xff] %v2090_v0 }
  0x3b   :  { %v1106_v38 = vld.sshfl [vmem:[#allocation1 + $0x8] sm:$0xff pattern:$0x75316420]  ;;  %v1105_v39 = vld.sshfl [vmem:[#allocation1] sm:$0xff pattern:$0x75316420] }
  0x3c   :  { %749 = vrot.lane.b32.xlu1 %v736_v29, %s2045_s29  ;;  %747 = vrot.lane.b32.xlu0 %v735_v30, %s2045_s29  ;;  %1285 = vst [vmem:[#allocation1] ss:$2 sm:$0xff] %v2095_v1 }
  0x3d   :  { %751 = vrot.lane.b32.xlu2 %v737_v28, %s2045_s29  ;;  %v1110_v45 = vld.sshfl [vmem:[#allocation1 + $0x28] sm:$0xff pattern:$0x75316420]  ;;  %v1109_v46 = vld.sshfl [vmem:[#allocation1 + $0x20] sm:$0xff pattern:$0x75316420] }
  0x3e   :  { %1289 = vst [vmem:[#allocation1 + $0x20] ss:$2 sm:$0xff] %v2100_v2 }
  0x41   :  { %v1293_v47 = vld.sshfl [vmem:[#allocation1 + $0x18] sm:$0xff pattern:$0x75316420]  ;;  %v1292_v48 = vld.sshfl [vmem:[#allocation1 + $0x10] sm:$0xff pattern:$0x75316420] }
  0x42   :  { %1472 = vst [vmem:[#allocation1 + $0x10] ss:$2 sm:$0xff] %v2090_v0 }
  0x43   :  { %v1291_v43 = vld.sshfl [vmem:[#allocation1 + $0x8] sm:$0xff pattern:$0x75316420]  ;;  %v1290_v44 = vld.sshfl [vmem:[#allocation1] sm:$0xff pattern:$0x75316420] }
  0x44   :  { %755 = vrot.lane.b32.xlu1 %v739_v31, %s2045_s29  ;;  %753 = vrot.lane.b32.xlu0 %v738_v27, %s2045_s29  ;;  %1470 = vst [vmem:[#allocation1] ss:$2 sm:$0xff] %v2095_v1 }
  0x45   :  { %757 = vrot.lane.b32.xlu2 %v740_v32, %s2045_s29  ;;  %v1294_v49 = vld.sshfl [vmem:[#allocation1 + $0x20] sm:$0xff pattern:$0x75316420]  ;;  %v1295_v50 = vld.sshfl [vmem:[#allocation1 + $0x28] sm:$0xff pattern:$0x75316420] }
  0x46   :  { %1474 = vst [vmem:[#allocation1 + $0x20] ss:$2 sm:$0xff] %v2100_v2 }
  0x49   :  { %v1477_v56 = vld.sshfl [vmem:[#allocation1 + $0x10] sm:$0xff pattern:$0x75316420]  ;;  %v1478_v63 = vld.sshfl [vmem:[#allocation1 + $0x18] sm:$0xff pattern:$0x75316420] }
  0x4b   :  { %v1476_v54 = vld.sshfl [vmem:[#allocation1 + $0x8] sm:$0xff pattern:$0x75316420]  ;;  %v1475_v55 = vld.sshfl [vmem:[#allocation1] sm:$0xff pattern:$0x75316420] }
  0x4c   :  { %934 = vrot.lane.b32.xlu1 %v921_v33, %s2046_s30  ;;  %932 = vrot.lane.b32.xlu0 %v920_v34, %s2046_s30 }
  0x4d   :  { %936 = vrot.lane.b32.xlu2 %v922_v36, %s2046_s30  ;;  %v1479_v62 = vld.sshfl [vmem:[#allocation1 + $0x20] sm:$0xff pattern:$0x75316420]  ;;  %v1480_v0 = vld.sshfl [vmem:[#allocation1 + $0x28] sm:$0xff pattern:$0x75316420] }
  0x54   :  { %940 = vrot.lane.b32.xlu1 %v924_v37, %s2046_s30  ;;  %938 = vrot.lane.b32.xlu0 %v923_v35, %s2046_s30  ;;  %v1921_v35 = vld [vmem:[%s2441_s1 + $0x18] sm:$0xff] }
  0x55   :  { %942 = vrot.lane.b32.xlu2 %v925_v40, %s2046_s30 }
  0x5c   :  { %1119 = vrot.lane.b32.xlu1 %v1106_v38, %s2047_s7  ;;  %1117 = vrot.lane.b32.xlu0 %v1105_v39, %s2047_s7 }
  0x5d   :  { %1121 = vrot.lane.b32.xlu2 %v1107_v42, %s2047_s7 }
  0x64   :  { %1125 = vrot.lane.b32.xlu1 %v1109_v46, %s2047_s7  ;;  %1123 = vrot.lane.b32.xlu0 %v1108_v41, %s2047_s7  ;;  %v1934_v46 = vld [vmem:[%s2441_s1 + $0x20] sm:$0xff] }
  0x65   :  { %1127 = vrot.lane.b32.xlu2 %v1110_v45, %s2047_s7 }
  0x66   :  { %v57_v51 = vpop.permute.xlu2 %56 }
  0x6c   :  { %1304 = vrot.lane.b32.xlu1 %v1291_v43, %s2048_s8  ;;  %1302 = vrot.lane.b32.xlu0 %v1290_v44, %s2048_s8 }
  0x6d   :  { %1306 = vrot.lane.b32.xlu2 %v1292_v48, %s2048_s8 }
  0x6e   :  { %v59_v52 = vpop.permute.xlu2 %58 }
  0x6f   :  { %v63_v15 = vsel %vm62_vm1, %v57_v51, %v59_v52 }
  0x74   :  { %1310 = vrot.lane.b32.xlu1 %v1294_v49, %s2048_s8  ;;  %1308 = vrot.lane.b32.xlu0 %v1293_v47, %s2048_s8 }
  0x75   :  { %1312 = vrot.lane.b32.xlu2 %v1295_v50, %s2048_s8 }
  0x77   :  { %v2141_v53 = vpop.permute.xlu2 %381 }
  0x7c   :  { %1489 = vrot.lane.b32.xlu1 %v1476_v54, %s2049_s9  ;;  %1487 = vrot.lane.b32.xlu0 %v1475_v55, %s2049_s9  ;;  %v53_v57 = vpop.permute.xlu1 %52  ;;  %v1947_v55 = vld [vmem:[%s2441_s1 + $0x28] sm:$0xff] }
  0x7d   :  { %v49_v59 = vpop.permute.xlu0 %48  ;;  %1491 = vrot.lane.b32.xlu2 %v1477_v56, %s2049_s9 }
  0x7e   :  { %v68_v16 = vsel %vm62_vm1, %v59_v52, %v49_v59 }
  0x7f   :  { %v388_v60 = vpop.permute.xlu2 %387 }
  0x84   :  { %1495 = vrot.lane.b32.xlu1 %v1479_v62, %s2049_s9  ;;  %1493 = vrot.lane.b32.xlu0 %v1478_v63, %s2049_s9  ;;  %v55_v1 = vpop.permute.xlu1 %54 }
  0x85   :  { %v51_v2 = vpop.permute.xlu0 %50  ;;  %v65_v3 = vsel %vm62_vm1, %v53_v57, %v55_v1  ;;  %v64_v4 = vsel %vm62_vm1, %v55_v1, %v57_v51  ;;  %1497 = vrot.lane.b32.xlu2 %v1480_v0, %s2049_s9 }
  0x86   :  { %v67_v6 = vsel %vm62_vm1, %v49_v59, %v51_v2  ;;  %v66_v7 = vsel %vm62_vm1, %v51_v2, %v53_v57  ;;  %1888 = vmatpush.msk.msra.mxu2 %vm75_vm0, %v65_v3  ;;  %1890 = vmatpush.msk.msra.mxu3 %vm75_vm0, %v64_v4  ;;  %v1960_v3 = vld [vmem:[%s2441_s1 + $0x30] sm:$0xff] }
  0x87   :  { %1884 = vmatpush.msk.msra.mxu0 %vm75_vm0, %v67_v6  ;;  %1886 = vmatpush.msk.msra.mxu1 %vm75_vm0, %v66_v7  ;;  %v567_v8 = vpop.permute.xlu2 %566 }
  0x88   :  { %1885 = vmatmul.msk.f32.vlgmr.msra.gmra.mxu0 %vm71_vm2, %v1883_v5  ;;  %1887 = vmatmul.msk.f32.vlgmr.msra.gmra.mxu1 %vm71_vm2, %v1883_v5 }
  0x89   :  { %1889 = vmatmul.msk.f32.vlgmr.msra.gmra.mxu2 %vm71_vm2, %v1883_v5  ;;  %1891 = vmatmul.msk.f32.vlgmr.msra.gmra.mxu3 %vm71_vm2, %v1883_v5 }
  0x8a   :  { %1892 = vmatpush.msk.msrb.mxu0 %vm75_vm0, %v63_v15  ;;  %1894 = vmatpush.msk.msrb.mxu1 %vm75_vm0, %v68_v16 }
  0x8b   :  { %1896 = vmatpush.msk.msrb.mxu2 %vm75_vm0, %v2113_v11  ;;  %1898 = vmatpush.msk.msrb.mxu3 %vm75_vm0, %v2115_v12  ;;  %v27_v11 = vld [vmem:[%s2441_s1] sm:$0xff] }
  0x8c   :  { %1900 = vmatpush.msk.msra.mxu0 %vm75_vm0, %v2108_v9  ;;  %1902 = vmatpush.msk.msra.mxu1 %vm75_vm0, %v2110_v10 }
  0x8d   :  { %1904 = vmatpush.msk.msra.mxu2 %vm75_vm0, %v2118_v13  ;;  %1906 = vmatpush.msk.msra.mxu3 %vm75_vm0, %v2120_v14 }
  0x8e   :  { %v380_v17 = vpop.permute.xlu1 %379  ;;  %v378_v18 = vpop.permute.xlu0 %377 }
  0x8f   :  { %v393_v12 = vsel %vm389_vm3, %v380_v17, %v2141_v53  ;;  %v394_v9 = vsel %vm389_vm3, %v378_v18, %v380_v17  ;;  %v573_v10 = vpop.permute.xlu2 %572  ;;  %v395_v23 = vsel %vm389_vm3, %v388_v60, %v378_v18 }
  0x90   :  { %1893 = vmatmul.msk.f32.vlgmr.msrb.gmra.mxu0 %vm71_vm2, %v1883_v5  ;;  %1895 = vmatmul.msk.f32.vlgmr.msrb.gmra.mxu1 %vm71_vm2, %v1883_v5 }
  0x91   :  { %1897 = vmatmul.msk.f32.vlgmr.msrb.gmra.mxu2 %vm71_vm2, %v27_v11  ;;  %1899 = vmatmul.msk.f32.vlgmr.msrb.gmra.mxu3 %vm71_vm2, %v27_v11 }
  0x92   :  { %1909 = vmatpush.msk.msrb.mxu0 %vm75_vm0, %v394_v9  ;;  %1911 = vmatpush.msk.msrb.mxu1 %vm75_vm0, %v393_v12  ;;  %v2050_v12 = vmov 0  }
  0x93   :  { %2010 = vset.pattern.permute.xlu0 %v2050_v12 }
  0x96   :  { %v386_v13 = vpop.permute.xlu1 %385  ;;  %v384_v14 = vpop.permute.xlu0 %383 }
  0x97   :  { %v391_v19 = vsel %vm389_vm3, %v384_v14, %v386_v13  ;;  %v392_v20 = vsel %vm389_vm3, %v2141_v53, %v384_v14  ;;  %v752_v21 = vpop.permute.xlu2 %751  ;;  %v390_v22 = vsel %vm389_vm3, %v386_v13, %v388_v60  ;;  %v1973_v13 = vld [vmem:[%s2441_s1 + $0x38] sm:$0xff] }
  0x98   :  { %1913 = vmatpush.msk.msrb.mxu2 %vm75_vm0, %v392_v20  ;;  %1915 = vmatpush.msk.msrb.mxu3 %vm75_vm0, %v391_v19 }
  0x99   :  { %1901 = vmatmul.msk.f32.vlgmr.msra.gmra.mxu0 %vm71_vm2, %v27_v11  ;;  %1903 = vmatmul.msk.f32.vlgmr.msra.gmra.mxu1 %vm71_vm2, %v27_v11 }
  0x9a   :  { %1905 = vmatmul.msk.f32.vlgmr.msra.gmra.mxu2 %vm71_vm2, %v27_v11  ;;  %1907 = vmatmul.msk.f32.vlgmr.msra.gmra.mxu3 %vm71_vm2, %v27_v11  ;;  %v1655_v11 = vld [vmem:[%s2442_s2] sm:$0xff] }
  0x9b   :  { %1919 = vmatpush.msk.msra.mxu1 %vm75_vm0, %v395_v23  ;;  %1917 = vmatpush.msk.msra.mxu0 %vm75_vm0, %v390_v22 }
  0x9c   :  { %1658 = vperm.xlu0 %2010, %v1655_v11   ;;  %v1673_v11 = vld [vmem:[%s2443_s3] sm:$0xff] }
  0x9d   :  { %1677 = vst [vmem:[#allocation1] ss:$4 sm:$0xff] %v1673_v11 }
  0x9e   :  { %v565_v24 = vpop.permute.xlu1 %564  ;;  %v563_v25 = vpop.permute.xlu0 %562 }
  0x9f   :  { %v578_v27 = vsel %vm574_vm4, %v565_v24, %v567_v8  ;;  %v579_v28 = vsel %vm574_vm4, %v563_v25, %v565_v24  ;;  %v758_v29 = vpop.permute.xlu2 %757  ;;  %v580_v30 = vsel %vm574_vm4, %v573_v10, %v563_v25 }
  0xa0   :  { %1922 = vmatpush.msk.msra.mxu2 %vm75_vm0, %v579_v28  ;;  %1924 = vmatpush.msk.msra.mxu3 %vm75_vm0, %v578_v27 }
  0xa1   :  { %1910 = vmatmul.msk.f32.vlgmr.msrb.gmra.mxu0 %vm71_vm2, %v1908_v26  ;;  %1912 = vmatmul.msk.f32.vlgmr.msrb.gmra.mxu1 %vm71_vm2, %v1908_v26 }
  0xa2   :  { %1914 = vmatmul.msk.f32.vlgmr.msrb.gmra.mxu2 %vm71_vm2, %v1908_v26  ;;  %1916 = vmatmul.msk.f32.vlgmr.msrb.gmra.mxu3 %vm71_vm2, %v1908_v26 }
  0xa3   :  { %1932 = vmatpush.msk.msrb.mxu3 %vm75_vm0, %v580_v30  ;;  %v1986_v30 = vld [vmem:[%s2441_s1 + $0x40] sm:$0xff] }
  0xa6   :  { %v571_v31 = vpop.permute.xlu1 %570  ;;  %v569_v32 = vpop.permute.xlu0 %568 }
  0xa7   :  { %v576_v33 = vsel %vm574_vm4, %v569_v32, %v571_v31  ;;  %v577_v34 = vsel %vm574_vm4, %v567_v8, %v569_v32  ;;  %v937_v36 = vpop.permute.xlu2 %936  ;;  %v575_v37 = vsel %vm574_vm4, %v571_v31, %v573_v10 }
  0xa8   :  { %1926 = vmatpush.msk.msrb.mxu0 %vm75_vm0, %v577_v34  ;;  %1928 = vmatpush.msk.msrb.mxu1 %vm75_vm0, %v576_v33 }
  0xa9   :  { %1918 = vmatmul.msk.f32.vlgmr.msra.gmra.mxu0 %vm71_vm2, %v1908_v26  ;;  %1920 = vmatmul.msk.f32.vlgmr.msra.gmra.mxu1 %vm71_vm2, %v1908_v26 }
  0xaa   :  { %1923 = vmatmul.msk.f32.vlgmr.msra.gmra.mxu2 %vm71_vm2, %v1921_v35  ;;  %1925 = vmatmul.msk.f32.vlgmr.msra.gmra.mxu3 %vm71_vm2, %v1921_v35 }
  0xab   :  { %1930 = vmatpush.msk.msrb.mxu2 %vm75_vm0, %v575_v37 }
  0xae   :  { %v750_v38 = vpop.permute.xlu1 %749  ;;  %v748_v39 = vpop.permute.xlu0 %747 }
  0xaf   :  { %v763_v40 = vsel %vm759_vm5, %v750_v38, %v752_v21  ;;  %v764_v41 = vsel %vm759_vm5, %v748_v39, %v750_v38  ;;  %v943_v42 = vpop.permute.xlu2 %942  ;;  %v765_v43 = vsel %vm759_vm5, %v758_v29, %v748_v39 }
  0xb0   :  { %1935 = vmatpush.msk.msra.mxu0 %vm75_vm0, %v764_v41  ;;  %1937 = vmatpush.msk.msra.mxu1 %vm75_vm0, %v763_v40 }
  0xb1   :  { %1927 = vmatmul.msk.f32.vlgmr.msrb.gmra.mxu0 %vm71_vm2, %v1921_v35  ;;  %1929 = vmatmul.msk.f32.vlgmr.msrb.gmra.mxu1 %vm71_vm2, %v1921_v35 }
  0xb2   :  { %1931 = vmatmul.msk.f32.vlgmr.msrb.gmra.mxu2 %vm71_vm2, %v1921_v35  ;;  %1933 = vmatmul.msk.f32.vlgmr.msrb.gmra.mxu3 %vm71_vm2, %v1921_v35 }
  0xb3   :  { %1945 = vmatpush.msk.msrb.mxu1 %vm75_vm0, %v765_v43 }
  0xb6   :  { %v756_v44 = vpop.permute.xlu1 %755  ;;  %v754_v45 = vpop.permute.xlu0 %753 }
  0xb7   :  { %v761_v47 = vsel %vm759_vm5, %v754_v45, %v756_v44  ;;  %v762_v48 = vsel %vm759_vm5, %v752_v21, %v754_v45  ;;  %v760_v49 = vsel %vm759_vm5, %v756_v44, %v758_v29  ;;  %v1122_v50 = vpop.permute.xlu2 %1121 }
  0xb8   :  { %1939 = vmatpush.msk.msra.mxu2 %vm75_vm0, %v762_v48  ;;  %1941 = vmatpush.msk.msra.mxu3 %vm75_vm0, %v761_v47 }
  0xb9   :  { %1936 = vmatmul.msk.f32.vlgmr.msra.gmra.mxu0 %vm71_vm2, %v1934_v46  ;;  %1938 = vmatmul.msk.f32.vlgmr.msra.gmra.mxu1 %vm71_vm2, %v1934_v46 }
  0xba   :  { %1940 = vmatmul.msk.f32.vlgmr.msra.gmra.mxu2 %vm71_vm2, %v1934_v46  ;;  %1942 = vmatmul.msk.f32.vlgmr.msra.gmra.mxu3 %vm71_vm2, %v1934_v46 }
  0xbb   :  { %1943 = vmatpush.msk.msrb.mxu0 %vm75_vm0, %v760_v49 }
  0xbe   :  { %v935_v51 = vpop.permute.xlu1 %934  ;;  %v933_v52 = vpop.permute.xlu0 %932 }
  0xbf   :  { %v948_v53 = vsel %vm944_vm6, %v935_v51, %v937_v36  ;;  %v949_v54 = vsel %vm944_vm6, %v933_v52, %v935_v51  ;;  %v950_v56 = vsel %vm944_vm6, %v943_v42, %v933_v52  ;;  %v1128_v57 = vpop.permute.xlu2 %1127 }
  0xc0   :  { %1948 = vmatpush.msk.msrb.mxu2 %vm75_vm0, %v949_v54  ;;  %1950 = vmatpush.msk.msrb.mxu3 %vm75_vm0, %v948_v53 }
  0xc1   :  { %1944 = vmatmul.msk.f32.vlgmr.msrb.gmra.mxu0 %vm71_vm2, %v1934_v46  ;;  %1946 = vmatmul.msk.f32.vlgmr.msrb.gmra.mxu1 %vm71_vm2, %v1934_v46 }
  0xc2   :  { %1949 = vmatmul.msk.f32.vlgmr.msrb.gmra.mxu2 %vm71_vm2, %v1947_v55  ;;  %1951 = vmatmul.msk.f32.vlgmr.msrb.gmra.mxu3 %vm71_vm2, %v1947_v55 }
  0xc3   :  { %1958 = vmatpush.msk.msra.mxu3 %vm75_vm0, %v950_v56 }
  0xc6   :  { %v941_v58 = vpop.permute.xlu1 %940  ;;  %v939_v59 = vpop.permute.xlu0 %938 }
  0xc7   :  { %v945_v60 = vsel %vm944_vm6, %v941_v58, %v943_v42  ;;  %v946_v62 = vsel %vm944_vm6, %v939_v59, %v941_v58  ;;  %v947_v63 = vsel %vm944_vm6, %v937_v36, %v939_v59  ;;  %v1307_v0 = vpop.permute.xlu2 %1306 }
  0xc8   :  { %1952 = vmatpush.msk.msra.mxu0 %vm75_vm0, %v947_v63  ;;  %1954 = vmatpush.msk.msra.mxu1 %vm75_vm0, %v946_v62 }
  0xc9   :  { %1956 = vmatpush.msk.msra.mxu2 %vm75_vm0, %v945_v60  ;;  %1953 = vmatmul.msk.f32.vlgmr.msra.gmra.mxu0 %vm71_vm2, %v1947_v55 }
  0xca   :  { %1955 = vmatmul.msk.f32.vlgmr.msra.gmra.mxu1 %vm71_vm2, %v1947_v55  ;;  %1957 = vmatmul.msk.f32.vlgmr.msra.gmra.mxu2 %vm71_vm2, %v1947_v55 }
  0xcb   :  { %1959 = vmatmul.msk.f32.vlgmr.msra.gmra.mxu3 %vm71_vm2, %v1947_v55 }
  0xce   :  { %v1120_v1 = vpop.permute.xlu1 %1119  ;;  %v1118_v2 = vpop.permute.xlu0 %1117 }
  0xcf   :  { %v1133_v4 = vsel %vm1129_vm7, %v1120_v1, %v1122_v50  ;;  %v1134_v5 = vsel %vm1129_vm7, %v1118_v2, %v1120_v1  ;;  %v1135_v6 = vsel %vm1129_vm7, %v1128_v57, %v1118_v2  ;;  %v1313_v18 = vpop.permute.xlu2 %1312 }
  0xd0   :  { %1961 = vmatpush.msk.msrb.mxu0 %vm75_vm0, %v1134_v5  ;;  %1963 = vmatpush.msk.msrb.mxu1 %vm75_vm0, %v1133_v4 }
  0xd1   :  { %1962 = vmatmul.msk.f32.vlgmr.msrb.gmra.mxu0 %vm71_vm2, %v1960_v3 }
  0xd2   :  { %1971 = vmatpush.msk.msra.mxu1 %vm75_vm0, %v1135_v6 }
  0xd3   :  { %1964 = vmatmul.msk.f32.vlgmr.msrb.gmra.mxu1 %vm71_vm2, %v1960_v3 }
  0xd6   :  { %v1126_v7 = vpop.permute.xlu1 %1125  ;;  %v1124_v8 = vpop.permute.xlu0 %1123 }
  0xd7   :  { %v1130_v15 = vsel %vm1129_vm7, %v1126_v7, %v1128_v57  ;;  %v1131_v16 = vsel %vm1129_vm7, %v1124_v8, %v1126_v7  ;;  %v1132_v17 = vsel %vm1129_vm7, %v1122_v50, %v1124_v8  ;;  %v1492_v21 = vpop.permute.xlu2 %1491 }
  0xd8   :  { %1965 = vmatpush.msk.msrb.mxu2 %vm75_vm0, %v1132_v17  ;;  %1967 = vmatpush.msk.msrb.mxu3 %vm75_vm0, %v1131_v16 }
  0xd9   :  { %1969 = vmatpush.msk.msra.mxu0 %vm75_vm0, %v1130_v15  ;;  %1966 = vmatmul.msk.f32.vlgmr.msrb.gmra.mxu2 %vm71_vm2, %v1960_v3 }
  0xda   :  { %1968 = vmatmul.msk.f32.vlgmr.msrb.gmra.mxu3 %vm71_vm2, %v1960_v3  ;;  %1970 = vmatmul.msk.f32.vlgmr.msra.gmra.mxu0 %vm71_vm2, %v1960_v3 }
  0xdb   :  { %1972 = vmatmul.msk.f32.vlgmr.msra.gmra.mxu1 %vm71_vm2, %v1960_v3 }
  0xde   :  { %v1305_v9 = vpop.permute.xlu1 %1304  ;;  %v1303_v10 = vpop.permute.xlu0 %1302 }
  0xdf   :  { %v1318_v14 = vsel %vm1314_vm8, %v1305_v9, %v1307_v0  ;;  %v1319_v19 = vsel %vm1314_vm8, %v1303_v10, %v1305_v9  ;;  %v1320_v20 = vsel %vm1314_vm8, %v1313_v18, %v1303_v10  ;;  %v1498_v27 = vpop.permute.xlu2 %1497 }
  0xe0   :  { %1974 = vmatpush.msk.msra.mxu2 %vm75_vm0, %v1319_v19  ;;  %1976 = vmatpush.msk.msra.mxu3 %vm75_vm0, %v1318_v14 }
  0xe1   :  { %1975 = vmatmul.msk.f32.vlgmr.msra.gmra.mxu2 %vm71_vm2, %v1973_v13 }
  0xe2   :  { %1984 = vmatpush.msk.msrb.mxu3 %vm75_vm0, %v1320_v20 }
  0xe3   :  { %1977 = vmatmul.msk.f32.vlgmr.msra.gmra.mxu3 %vm71_vm2, %v1973_v13 }
  0xe6   :  { %v1311_v22 = vpop.permute.xlu1 %1310  ;;  %v1309_v23 = vpop.permute.xlu0 %1308 }
  0xe7   :  { %v1315_v24 = vsel %vm1314_vm8, %v1311_v22, %v1313_v18  ;;  %v1316_v25 = vsel %vm1314_vm8, %v1309_v23, %v1311_v22  ;;  %v1317_v26 = vsel %vm1314_vm8, %v1307_v0, %v1309_v23 }
  0xe8   :  { %1978 = vmatpush.msk.msrb.mxu0 %vm75_vm0, %v1317_v26  ;;  %1980 = vmatpush.msk.msrb.mxu1 %vm75_vm0, %v1316_v25 }
  0xe9   :  { %1982 = vmatpush.msk.msrb.mxu2 %vm75_vm0, %v1315_v24  ;;  %1979 = vmatmul.msk.f32.vlgmr.msrb.gmra.mxu0 %vm71_vm2, %v1973_v13 }
  0xea   :  { %1981 = vmatmul.msk.f32.vlgmr.msrb.gmra.mxu1 %vm71_vm2, %v1973_v13  ;;  %1983 = vmatmul.msk.f32.vlgmr.msrb.gmra.mxu2 %vm71_vm2, %v1973_v13 }
  0xeb   :  { %1985 = vmatmul.msk.f32.vlgmr.msrb.gmra.mxu3 %vm71_vm2, %v1973_v13  ;;  %v1674_v13 = vld [vmem:[%s2443_s3 + $0x8] sm:$0xf] }
  0xec   :  { %1679 = vst [vmem:[#allocation1 + $0x20] ss:$4 sm:$0xff] %v1674_v13 }
  0xee   :  { %v1490_v28 = vpop.permute.xlu1 %1489  ;;  %v1488_v29 = vpop.permute.xlu0 %1487 }
  0xef   :  { %v1503_v31 = vsel %vm1499_vm9, %v1490_v28, %v1492_v21  ;;  %v1504_v32 = vsel %vm1499_vm9, %v1488_v29, %v1490_v28  ;;  %v1505_v33 = vsel %vm1499_vm9, %v1498_v27, %v1488_v29 }
  0xf0   :  { %1987 = vmatpush.msk.msra.mxu0 %vm75_vm0, %v1504_v32  ;;  %1989 = vmatpush.msk.msra.mxu1 %vm75_vm0, %v1503_v31 }
  0xf1   :  { %1988 = vmatmul.msk.f32.vlgmr.msra.gmra.mxu0 %vm71_vm2, %v1986_v30 }
  0xf2   :  { %1997 = vmatpush.msk.msrb.mxu1 %vm75_vm0, %v1505_v33 }
  0xf3   :  { %1990 = vmatmul.msk.f32.vlgmr.msra.gmra.mxu1 %vm71_vm2, %v1986_v30 }
  0xf6   :  { %v1496_v34 = vpop.permute.xlu1 %1495  ;;  %v1494_v35 = vpop.permute.xlu0 %1493 }
  0xf7   :  { %v1500_v36 = vsel %vm1499_vm9, %v1496_v34, %v1498_v27  ;;  %v1501_v37 = vsel %vm1499_vm9, %v1494_v35, %v1496_v34  ;;  %v1502_v38 = vsel %vm1499_vm9, %v1492_v21, %v1494_v35 }
  0xf8   :  { %1991 = vmatpush.msk.msra.mxu2 %vm75_vm0, %v1502_v38  ;;  %1993 = vmatpush.msk.msra.mxu3 %vm75_vm0, %v1501_v37 }
  0xf9   :  { %1995 = vmatpush.msk.msrb.mxu0 %vm75_vm0, %v1500_v36  ;;  %1992 = vmatmul.msk.f32.vlgmr.msra.gmra.mxu2 %vm71_vm2, %v1986_v30 }
  0xfa   :  { %1994 = vmatmul.msk.f32.vlgmr.msra.gmra.mxu3 %vm71_vm2, %v1986_v30  ;;  %1996 = vmatmul.msk.f32.vlgmr.msrb.gmra.mxu0 %vm71_vm2, %v1986_v30 }
  0xfb   :  { %1998 = vmatmul.msk.f32.vlgmr.msrb.gmra.mxu1 %vm71_vm2, %v1986_v30 }
 0x105   :  { %v111_v39 = vpop.f32.mrf.mxu0  ;;  %v131_v40 = vpop.f32.mrf.mxu1 }
 0x10c   :  { %v151_v41 = vpop.f32.mrf.mxu2  ;;  %v171_v42 = vpop.f32.mrf.mxu3 }
 0x10d   :  { %v191_v61 = vpop.f32.mrf.mxu0  ;;  %v211_v43 = vpop.f32.mrf.mxu1 }
 0x114   :  { %v257_v44 = vpop.f32.mrf.mxu2  ;;  %v277_v45 = vpop.f32.mrf.mxu3 }
 0x115   :  { %v258_v21 = vadd.f32 %v257_v44, %v111_v39  ;;  %v278_v22 = vadd.f32 %v277_v45, %v131_v40 }
 0x116   :  { %v297_v46 = vpop.f32.mrf.mxu0  ;;  %v317_v47 = vpop.f32.mrf.mxu1 }
 0x117   :  { %v2395_v48 = vadd.f32 %v297_v46, %v151_v41  ;;  %v2397_v49 = vadd.f32 %v317_v47, %v171_v42  ;;  %v1659_v46 = vpop.permute.xlu0 %1658 }
 0x11d   :  { %v337_v50 = vpop.f32.mrf.mxu2  ;;  %v357_v51 = vpop.f32.mrf.mxu3 }
 0x11e   :  { %v436_v52 = vpop.f32.mrf.mxu0  ;;  %v456_v53 = vpop.f32.mrf.mxu1  ;;  %v338_v33 = vadd.f32 %v337_v50, %v191_v61  ;;  %v358_v36 = vadd.f32 %v357_v51, %v211_v43 }
 0x11f   :  { %v539_v23 = vadd.f32 %v436_v52, %v258_v21  ;;  %v540_v24 = vadd.f32 %v456_v53, %v278_v22 }
 0x125   :  { %v476_v54 = vpop.f32.mrf.mxu2  ;;  %v2399_v55 = vpop.f32.mrf.mxu3 }
 0x126   :  { %v516_v56 = vpop.f32.mrf.mxu0  ;;  %v536_v57 = vpop.f32.mrf.mxu1  ;;  %v542_v43 = vadd.f32 %v2399_v55, %v2397_v49  ;;  %v1681_v49 = vld.sshfl [vmem:[#allocation1 + $0x8] sm:$0xff pattern:$0x73625140] }
 0x127   :  { %v543_v38 = vadd.f32 %v516_v56, %v338_v33  ;;  %v544_v42 = vadd.f32 %v536_v57, %v358_v36 }
 0x12d   :  { %v621_v60 = vpop.f32.mrf.mxu2  ;;  %v641_v62 = vpop.f32.mrf.mxu3 }
 0x12e   :  { %v2401_v58 = vpop.f32.mrf.mxu0  ;;  %v2403_v59 = vpop.f32.mrf.mxu1  ;;  %v724_v25 = vadd.f32 %v621_v60, %v539_v23  ;;  %v725_v26 = vadd.f32 %v641_v62, %v540_v24 }
 0x135   :  { %v701_v1 = vpop.f32.mrf.mxu2  ;;  %v721_v2 = vpop.f32.mrf.mxu3 }
 0x136   :  { %v806_v63 = vpop.f32.mrf.mxu0  ;;  %v826_v0 = vpop.f32.mrf.mxu1  ;;  %v728_v40 = vadd.f32 %v701_v1, %v543_v38  ;;  %v729_v47 = vadd.f32 %v721_v2, %v544_v42  ;;  %v727_v2 = vadd.f32 %v2403_v59, %v542_v43 }
 0x137   :  { %v909_v28 = vadd.f32 %v806_v63, %v724_v25  ;;  %v910_v30 = vadd.f32 %v826_v0, %v725_v26  ;;  %v541_v63 = vadd.f32 %v476_v54, %v2395_v48  ;;  %v1680_v48 = vld.sshfl [vmem:[#allocation1] sm:$0xff pattern:$0x73625140] }
 0x139   :  { %v726_v57 = vadd.f32 %v2401_v58, %v541_v63 }
 0x13d   :  { %v846_v5 = vpop.f32.mrf.mxu2  ;;  %v2405_v6 = vpop.f32.mrf.mxu3 }
 0x13e   :  { %v886_v3 = vpop.f32.mrf.mxu0  ;;  %v906_v4 = vpop.f32.mrf.mxu1  ;;  %v912_v54 = vadd.f32 %v2405_v6, %v727_v2 }
 0x13f   :  { %v913_v60 = vadd.f32 %v886_v3, %v728_v40  ;;  %v914_v61 = vadd.f32 %v906_v4, %v729_v47  ;;  %v2011_v47 = vld [vmem:[%s2445_s5] ss:$0 sm:$0xff] }
 0x145   :  { %v991_v15 = vpop.f32.mrf.mxu2  ;;  %v1011_v16 = vpop.f32.mrf.mxu3 }
 0x146   :  { %v2407_v7 = vpop.f32.mrf.mxu0  ;;  %v1094_v31 = vadd.f32 %v991_v15, %v909_v28  ;;  %v1095_v34 = vadd.f32 %v1011_v16, %v910_v30 }
 0x147   :  { %v2409_v8 = vpop.f32.mrf.mxu1 }
 0x14d   :  { %v1071_v12 = vpop.f32.mrf.mxu2 }
 0x14e   :  { %v1176_v17 = vpop.f32.mrf.mxu0  ;;  %v1091_v9 = vpop.f32.mrf.mxu3  ;;  %v1098_v51 = vadd.f32 %v1071_v12, %v913_v60 }
 0x14f   :  { %v1279_v37 = vadd.f32 %v1176_v17, %v1094_v31  ;;  %v1099_v0 = vadd.f32 %v1091_v9, %v914_v61  ;;  %v1097_v9 = vadd.f32 %v2409_v8, %v912_v54  ;;  %v1684_v8 = vld.sshfl [vmem:[#allocation1 + $0x20] sm:$0xff pattern:$0x73625140] }
 0x150   :  { %v1196_v18 = vpop.f32.mrf.mxu1 }
 0x151   :  { %v1280_v41 = vadd.f32 %v1196_v18, %v1095_v34  ;;  %v911_v18 = vadd.f32 %v846_v5, %v726_v57 }
 0x153   :  { %v1096_v55 = vadd.f32 %v2407_v7, %v911_v18 }
 0x157   :  { %v1256_v10 = vpop.f32.mrf.mxu0 }
 0x158   :  { %v1276_v14 = vpop.f32.mrf.mxu1  ;;  %v1283_v16 = vadd.f32 %v1256_v10, %v1098_v51 }
 0x159   :  { %v1284_v11 = vadd.f32 %v1276_v14, %v1099_v0 }
 0x15c   :  { %v1216_v19 = vpop.f32.mrf.mxu2 }
 0x15d   :  { %v2417_v20 = vpop.f32.mrf.mxu3  ;;  %v1281_v10 = vadd.f32 %v1216_v19, %v1096_v55 }
 0x15e   :  { %v1282_v5 = vadd.f32 %v2417_v20, %v1097_v9  ;;  %v1682_v20 = vld.sshfl [vmem:[#allocation1 + $0x10] sm:$0xff pattern:$0x73625140] }
 0x164   :  { %v1361_v32 = vpop.f32.mrf.mxu2 }
 0x165   :  { %v1464_v39 = vadd.f32 %v1361_v32, %v1279_v37  ;;  %v1685_v32 = vld.sshfl [vmem:[#allocation1 + $0x28] sm:$0xff pattern:$0x73625140] }
 0x166   :  { %v1401_v27 = vpop.f32.mrf.mxu0  ;;  %v1381_v35 = vpop.f32.mrf.mxu3 }
 0x167   :  { %v1421_v29 = vpop.f32.mrf.mxu1  ;;  %v1465_v44 = vadd.f32 %v1381_v35, %v1280_v41  ;;  %v1466_v22 = vadd.f32 %v1401_v27, %v1281_v10  ;;  %v1683_v27 = vld.sshfl [vmem:[#allocation1 + $0x18] sm:$0xff pattern:$0x73625140] }
 0x168   :  { %v1467_v23 = vadd.f32 %v1421_v29, %v1282_v5  ;;  %v1812_v29 = vld [vmem:[%s2444_s4] sm:$0xff]  ;;  %s2051_s4 = smov [#allocation2]  }
 0x169   :  { %s1872_s5 = sshll.u32 %s2051_s4, 4  ;;  %s1873_s5 = int_to_ptr.vmem [resolvable:$true] %s1872_s5 }
 0x16d   :  { %v1441_v1 = vpop.f32.mrf.mxu2 }
 0x16e   :  { %v1546_v45 = vpop.f32.mrf.mxu0  ;;  %v1461_v17 = vpop.f32.mrf.mxu3  ;;  %v1468_v4 = vadd.f32 %v1441_v1, %v1283_v16 }
 0x16f   :  { %v1649_v52 = vadd.f32 %v1546_v45, %v1464_v39  ;;  %v1469_v58 = vadd.f32 %v1461_v17, %v1284_v11 }
 0x170   :  { %v1566_v53 = vpop.f32.mrf.mxu1 }
 0x171   :  { %v1650_v62 = vadd.f32 %v1566_v53, %v1465_v44  ;;  %v1661_v50 = vadd.f32 %v1659_v46, %v1649_v52 }
 0x173   :  { %v1662_v56 = vadd.f32 %v1659_v46, %v1650_v62  ;;  %v1667_v15 = vmax.f32 %v1661_v50, 0.0 }
 0x175   :  { %v1668_v3 = vmax.f32 %v1662_v56, 0.0  ;;  %1707 = vmatpush.xpose.msrb.mxu2 %v1667_v15 }
 0x177   :  { %1727 = vmatpush.xpose.msrb.mxu3 %v1668_v3  ;;  %v1626_v12 = vpop.f32.mrf.mxu0 }
 0x178   :  { %v1653_v13 = vadd.f32 %v1626_v12, %v1468_v4  ;;  %v1646_v59 = vpop.f32.mrf.mxu1  ;;  %1708 = vmatmul.f32.vlgmr.msrb.gmra.mxu2 %v1680_v48 }
 0x179   :  { %v1654_v21 = vadd.f32 %v1646_v59, %v1469_v58 }
 0x17a   :  { %1728 = vmatmul.f32.vlgmr.msrb.gmra.mxu3 %v1681_v49  ;;  %v1665_v14 = vadd.f32 %v1659_v46, %v1653_v13 }
 0x17b   :  { %v1666_v6 = vadd.f32 %v1659_v46, %v1654_v21 }
 0x17c   :  { %v1671_v24 = vmax.f32 %v1665_v14, 0.0  ;;  %v1586_v25 = vpop.f32.mrf.mxu2 }
 0x17d   :  { %v1672_v26 = vmax.f32 %v1666_v6, 0.0  ;;  %v1651_v7 = vadd.f32 %v1586_v25, %v1466_v22  ;;  %v1606_v28 = vpop.f32.mrf.mxu3 }
 0x17e   :  { %v1652_v30 = vadd.f32 %v1606_v28, %v1467_v23  ;;  %1787 = vmatpush.xpose.msra.mxu2 %v1671_v24 }
 0x17f   :  { %v1663_v31 = vadd.f32 %v1659_v46, %v1651_v7  ;;  %1807 = vmatpush.xpose.msra.mxu3 %v1672_v26 }
 0x180   :  { %v1664_v19 = vadd.f32 %v1659_v46, %v1652_v30 }
 0x181   :  { %v1669_v33 = vmax.f32 %v1663_v31, 0.0  ;;  %1788 = vmatmul.f32.vlgmr.msra.gmra.mxu2 %v1684_v8 }
 0x182   :  { %v1670_v34 = vmax.f32 %v1664_v19, 0.0  ;;  %1808 = vmatmul.f32.vlgmr.msra.gmra.mxu3 %v1685_v32 }
 0x183   :  { %1747 = vmatpush.xpose.msra.mxu0 %v1669_v33 }
 0x184   :  { %1767 = vmatpush.xpose.msra.mxu1 %v1670_v34 }
 0x186   :  { %1748 = vmatmul.f32.vlgmr.msra.gmra.mxu0 %v1682_v20 }
 0x187   :  { %1768 = vmatmul.f32.vlgmr.msra.gmra.mxu1 %v1683_v27  ;;  %1836 = vmatpush.msrb.mxu0 %v1812_v29 }
 0x1fb   :  { %v1709_v35 = vpop.f32.mrf.mxu2 }
 0x1fd   :  { %v1729_v36 = vpop.f32.mrf.mxu3 }
 0x1fe   :  { %v1730_v37 = vadd.f32 %v1729_v36, %v1709_v35 }
 0x203   :  { %v1749_v38 = vpop.f32.mrf.mxu0 }
 0x204   :  { %v1750_v41 = vadd.f32 %v1749_v38, %v1730_v37  ;;  %v1769_v42 = vpop.f32.mrf.mxu1  ;;  %v1789_v39 = vpop.f32.mrf.mxu2 }
 0x205   :  { %v1809_v44 = vpop.f32.mrf.mxu3 }
 0x206   :  { %v1770_v40 = vadd.f32 %v1769_v42, %v1750_v41 }
 0x208   :  { %v1790_v45 = vadd.f32 %v1789_v39, %v1770_v40 }
 0x20a   :  { %v1810_v46 = vadd.f32 %v1809_v44, %v1790_v45 }
 0x20c   :  { %1999 = vmatmul.msk.f32.vlgmr.msrb.gmra.mxu0 %vm1817_vm10, %v1810_v46 }
 0x289   :  { %v1838_v52 = vpop.f32.mrf.mxu0 }
 0x28a   :  { %v1839_v53 = vadd.f32 %v2011_v47, %v1838_v52 }
 0x28c   :  { %v1842_v60 = vsel %vm1841_vm11, %v1839_v53, -inf }
 0x28d   :  { %1843 = vmax.xlane.f32.xlu1 %v1842_v60 }
 0x300   :  { %v1844_v62 = vpop.xlane.xlu1 %1843 }
 0x301   :  { %v1845_v63 = vsub.f32 %v1839_v53, %v1844_v62 }
 0x303   :  { %v1846_v61 = vmul.f32 1.442695, %v1845_v63 }
 0x305   :  { %2012 = vpow2.f32 %v1846_v61 }
 0x30b   :  { %v2013_v50 = vpop.eup %2012 }
 0x30c   :  { %v1848_v43 = vsel %vm1841_vm11, %v2013_v50, 0.0 }
 0x30d   :  { %1849 = vadd.xlane.f32.xlu2 %v1848_v43 }
 0x380   :  { %v1850_v51 = vpop.xlane.xlu2 %1849 }
 0x381   :  { %2014 = vrcp.f32 %v1850_v51  ;;  %v1862_v1 = vand.u32 2147483648, %v1850_v51  ;;  %v1860_v2 = vand.u32 2147483647, %v1850_v51  ;;  %vm1856_vm13 = vweird.f32 %v1850_v51 }
 0x383   :  { %v1863_v17 = vor.u32 1.1754944e-38, %v1862_v1  ;;  %vm1861_vm15 = vcmp.eq.f32.partialorder %v1860_v2, 8.507059e+37 }
 0x387   :  { %v2015_v56 = vpop.eup %2014 }
 0x388   :  { %v1852_v57 = vmul.f32 %v2015_v56, %v1850_v51  ;;  %vm1857_vm12 = vweird.f32 %v2015_v56 }
 0x389   :  { %vm1858_vm14 = vmor %vm1856_vm13, %vm1857_vm12 }
 0x38a   :  { %v1853_v0 = vsub.f32 1.0, %v1852_v57 }
 0x38c   :  { %v1854_v15 = vmul.f32 %v2015_v56, %v1853_v0 }
 0x38e   :  { %v1855_v16 = vadd.f32 %v2015_v56, %v1854_v15 }
 0x390   :  { %v1859_v3 = vsel %vm1858_vm14, %v2015_v56, %v1855_v16 }
 0x391   :  { %v1864_v18 = vsel %vm1861_vm15, %v1863_v17, %v1859_v3 }
 0x392   :  { %v1865_v11 = vmul.f32 %v2013_v50, %v1864_v18 }
 0x394   :  { %1866 = vst.msk [vmem:[#allocation2] sm:$0x3] %vm1841_vm11, %v1865_v11 }
 0x395   :  { %1877 = dma.vmem_to_hbm [thread:$0]  %s1873_s5, 32, %s1875_s12, [#allocation3]  }
 0x396   :  { %2040 = dma.done.wait [#allocation3], 32  }
 0x397   :  { %2041 = vsyncadd [#allocation3], 4294967264 }
 0x398   :  { %1882 = vsyncpa [#allocation3], 1 }

</bundles_post_ra>
